<compile_context>
chip_gen: v7x
topology: tpu7x:2x2x1
jax: 0.10.0
libtpu: 0.0.40
codegen_flags: <defaults>
</compile_context>

<pallas_src>
import functools

import jax
import jax.numpy as jnp
from jax.experimental import pallas as pl
from jax.experimental.pallas import tpu as pltpu


def _round_up(a, b):
    return ((a + b - 1) // b) * b


def _decoder_kernel(wT_ref, x_ref, out_ref, carry_ref, *,
                    sp, num_taps, tile_t, t_valid):
    """One (batch b, frame-tile t) step.

    wT_ref:    (D*Sp, C)   tap-padded, transposed ConvTranspose1d weight
    x_ref:     (C, TILE_T) input frames of this tile (native dtype)
    out_ref:   (Sp, TILE_T) output frames of this tile (sample-major rows)
    carry_ref: (Sp, TILE_T) overlap-add spill from the previous frame tile
                            (only the first D-1 lanes are ever nonzero)
    """
    t = pl.program_id(1)

    # First frame tile of a batch: no spill from a previous tile.
    @pl.when(t == 0)
    def _():
        carry_ref[...] = jnp.zeros_like(carry_ref)

    # All tap contributions for this tile in a single MXU matmul; operands in
    # native dtype, f32 accumulation.
    y = jnp.dot(wT_ref[...], x_ref[...], preferred_element_type=jnp.float32)

    # Zero columns whose global input-frame index is >= T.  The tail tile (and
    # the optional carry-flush tile) read padding / stale VMEM there — Pallas
    # does NOT zero-fill partial edge blocks, so this mask is load-bearing.
    frame = t * tile_t + jax.lax.broadcasted_iota(jnp.int32, y.shape, 1)
    y = jnp.where(frame < t_valid, y, 0.0)

    # Overlap-add: tap group d contributes to output frame u = t_in + d, i.e. a
    # lane shift by d.  pltpu.roll rotates; the wrapped-around lanes (u < d)
    # are contributions that belong to the first d frames of the NEXT tile, so
    # collect them in `spill` and pass them forward via the carry scratch.
    acc = y[0:sp, :]
    spill = jnp.zeros_like(acc)
    lane = jax.lax.broadcasted_iota(jnp.int32, acc.shape, 1)
    for d in range(1, num_taps):                 # static, tiny (D-1 iterations)
        r = pltpu.roll(y[d * sp:(d + 1) * sp, :], shift=d, axis=1)
        acc = acc + r
        spill = spill + jnp.where(lane < d, r, 0.0)

    out_ref[...] = (acc - spill + carry_ref[...]).astype(out_ref.dtype)
    carry_ref[...] = spill


def decoder_forward(x, weight, *, stride, tile_t=2048):
    """Pallas forward of Decoder.

    x:      (B, C, T)      with C = decoder_dim
    weight: (C, 1, K)      PyTorch nn.ConvTranspose1d weight layout (bias=False)
    Returns (B, 1, L) with L = (T - 1) * stride + K.
    """
    B, C, T = x.shape
    K = weight.shape[-1]
    L = (T - 1) * stride + K

    num_taps = -(-K // stride)          # D = ceil(K/S): overlapping frames
    sp = _round_up(stride, 8)           # sublane-aligned rows per tap group
    taps_p = num_taps * sp

    # Frame-tile (lane) size: multiple of 128 for unmasked, lane-dense stores.
    if T < 128:
        # Tiny inputs: pad the time axis once up to a single 128-lane tile.
        x_in = jnp.pad(x, ((0, 0), (0, 0), (0, 128 - T)))
        tt = 128
    else:
        # Production sizes: no wrapper-side pad/fold; the tail is masked inside
        # the kernel.  tile_t=2048 (~4 MiB f32 at C=512) suits v7x's VMEM;
        # raise to 4096-8192 on v5e/v6e if per-step overhead shows up.
        x_in = x
        tt = min(_round_up(tile_t, 128), (T // 128) * 128)
    t_in = x_in.shape[-1]

    assert num_taps <= tt, "win_size/stride ratio too large for the frame tile"

    nt_in = -(-t_in // tt)                    # valid input-frame tiles
    nt = max(-(-(T + num_taps - 1) // tt), 1)  # output tiles (may add a carry-flush tile)
    fp = nt * tt                              # padded number of output frames

    # Weight: (C, 1, K) -> pad taps to D*S -> regroup to (D, Sp, C) with
    # sublane-aligned (Sp) tap groups -> (D*Sp, C).
    w2 = weight[:, 0, :]
    w_pad = jnp.pad(w2, ((0, 0), (0, num_taps * stride - K)))          # (C, D*S)
    wT = jnp.transpose(
        jnp.pad(w_pad.reshape(C, num_taps, stride),
                ((0, 0), (0, 0), (0, sp - stride))),
        (1, 2, 0)).reshape(taps_p, C)                                   # (D*Sp, C)

    kernel_fn = functools.partial(_decoder_kernel, sp=sp, num_taps=num_taps,
                                  tile_t=tt, t_valid=T)

    # Explicit VMEM budget with headroom (v7x has only 64 MiB physical).
    itemsize = x.dtype.itemsize
    vmem_est = (2 * C * tt * itemsize                 # double-buffered x tile
                + 2 * taps_p * C * wT.dtype.itemsize  # weight
                + 2 * sp * tt * itemsize              # double-buffered out tile
                + sp * tt * 4                         # carry scratch
                + (taps_p + 2 * sp) * tt * 4)         # y / acc / spill values
    vmem_limit = int(min(48 * 2 ** 20, max(16 * 2 ** 20, 4 * vmem_est)))

    out3 = pl.pallas_call(
        kernel_fn,
        out_shape=jax.ShapeDtypeStruct((B, sp, fp), x.dtype),
        grid=(B, nt),
        in_specs=[
            pl.BlockSpec((taps_p, C), lambda b, t: (0, 0)),
            # Clamp the frame-tile index: the optional carry-flush tile (one
            # past the last real input tile) re-reads the last tile and is
            # fully masked inside the kernel.
            pl.BlockSpec((None, C, tt),
                         lambda b, t: (b, 0, jnp.minimum(t, nt_in - 1))),
        ],
        out_specs=pl.BlockSpec((None, sp, tt), lambda b, t: (b, 0, t)),
        scratch_shapes=[pltpu.VMEM((sp, tt), jnp.float32)],
        compiler_params=pltpu.CompilerParams(
            dimension_semantics=("parallel", "arbitrary"),
            vmem_limit_bytes=vmem_limit),
    )(wT, x_in)

    # (B, Sp, Fp) -> (B, Fp, S) -> (B, Fp*S) -> trim to L -> (B, 1, L).
    # TODO(synk): if the model tolerates bf16 activations, feed x as bf16 to
    # halve HBM traffic (accumulation stays f32 inside the kernel).
    out = out3.transpose(0, 2, 1)[:, :, :stride].reshape(B, fp * stride)
    return out[:, :L][:, None, :]


def reference(x, weight, stride):
    """Pure-JAX ConvTranspose1d(C, 1, K, bias=False, stride) reference."""
    B, C, T = x.shape
    K = weight.shape[-1]
    L = (T - 1) * stride + K
    contrib = jnp.einsum("bct,ck->btk", x, weight[:, 0, :])     # (B, T, K)
    out = jnp.zeros((B, L), jnp.float32)
    for k in range(K):                                          # small static K
        out = out.at[:, k + stride * jnp.arange(T)].add(contrib[:, :, k])
    return out[:, None, :].astype(x.dtype)


if __name__ == "__main__":
    # Decoder(decoder_dim=32, win_size=16, stride=8), batch=2, 16 encoded frames.
    B, C, T = 2, 32, 16
    win_size, stride = 16, 8

    key = jax.random.PRNGKey(0)
    kx, kw = jax.random.split(key)
    x = jax.random.normal(kx, (B, C, T), jnp.float32)
    # nn.ConvTranspose1d(C, 1, win_size, bias=False) weight layout: (C, 1, K).
    weight = 0.2 * jax.random.normal(kw, (C, 1, win_size), jnp.float32)

    out = decoder_forward(x, weight, stride=stride)
    out = jax.block_until_ready(out)

    ref = reference(x, weight, stride)
    assert out.shape == ref.shape == (B, 1, (T - 1) * stride + win_size), out.shape
    assert jnp.allclose(out, ref, atol=1e-4, rtol=1e-4), \
        float(jnp.max(jnp.abs(out - ref)))

    print("KERNEL_OK")
</pallas_src>

<mosaic_0001>
module attributes {stable_mosaic.version = 11 : i64} {
  func.func @_decoder_kernel(%arg0: i32, %arg1: i32, %arg2: memref<16x32xf32, #tpu.memory_space<vmem>>, %arg3: memref<1x32x128xf32, #tpu.memory_space<vmem>>, %arg4: memref<1x8x128xf32, #tpu.memory_space<vmem>>, %arg5: memref<8x128xf32, #tpu.memory_space<vmem>>) attributes {dimension_semantics = [#tpu.dimension_semantics<parallel>, #tpu.dimension_semantics<arbitrary>], iteration_bounds = array<i64: 2, 1>, scalar_prefetch = 0 : i64, scratch_operands = 1 : i64, tpu.core_type = #tpu.core_type<tc>, window_params = [{pipeline_mode = #tpu.pipeline_mode<synchronous>, transform_indices = @transform_0, window_bounds = array<i64: 16, 32>}, {transform_indices = @transform_1, window_bounds = array<i64: 1, 32, 128>}, {transform_indices = @transform_2, window_bounds = array<i64: 1, 8, 128>}]} {
    %c0_i32 = arith.constant 0 : i32
    %0 = arith.cmpi eq, %arg1, %c0_i32 : i32
    %1 = arith.extui %0 : i1 to i32
    %c0_i32_0 = arith.constant 0 : i32
    %2 = arith.cmpi ne, %1, %c0_i32_0 : i32
    scf.if %2 {
      %cst_16 = arith.constant 0.000000e+00 : f32
      %33 = vector.broadcast %cst_16 : f32 to vector<8x128xf32>
      %c0_17 = arith.constant 0 : index
      %c0_18 = arith.constant 0 : index
      %34 = vector.load %arg5[%c0_17, %c0_18] : memref<8x128xf32, #tpu.memory_space<vmem>>, vector<8x128xf32>
      tpu.vector_store %arg5[%c0_17, %c0_18], %33 {strides = array<i32>} : memref<8x128xf32, #tpu.memory_space<vmem>>, vector<8x128xf32>,
    } else {
    }
    %c0 = arith.constant 0 : index
    %c0_1 = arith.constant 0 : index
    %3 = vector.load %arg2[%c0, %c0_1] : memref<16x32xf32, #tpu.memory_space<vmem>>, vector<16x32xf32>
    %c0_2 = arith.constant 0 : index
    %c0_3 = arith.constant 0 : index
    %c0_4 = arith.constant 0 : index
    %4 = vector.load %arg3[%c0_2, %c0_3, %c0_4] : memref<1x32x128xf32, #tpu.memory_space<vmem>>, vector<1x32x128xf32>
    %5 = vector.shape_cast %4 : vector<1x32x128xf32> to vector<32x128xf32>
    %cst = arith.constant dense<0.000000e+00> : vector<16x128xf32>
    %6 = tpu.matmul %3, %5, %cst {dimension_numbers = #tpu.dot_dimension_numbers<[1], [0], [0], [1], [0, 0, 1, 1], [], []>} : vector<16x32xf32>, vector<32x128xf32>, vector<16x128xf32> -> vector<16x128xf32>
    %c128_i32 = arith.constant 128 : i32
    %7 = arith.muli %arg1, %c128_i32 : i32
    %8 = tpu.iota {dimensions = array<i32: 1>} : vector<16x128xi32>
    %9 = vector.broadcast %7 : i32 to vector<16x128xi32>
    %10 = arith.addi %9, %8 : vector<16x128xi32>
    %c16_i32 = arith.constant 16 : i32
    %11 = vector.broadcast %c16_i32 : i32 to vector<16x128xi32>
    %12 = arith.cmpi slt, %10, %11 : vector<16x128xi32>
    %cst_5 = arith.constant 0.000000e+00 : f32
    %13 = vector.broadcast %cst_5 : f32 to vector<16x128xf32>
    %14 = arith.select %12, %6, %13 : vector<16x128xi1>, vector<16x128xf32>
    %15 = vector.extract_strided_slice %14 {offsets = [0, 0], sizes = [8, 128], strides = [1, 1]} : vector<16x128xf32> to vector<8x128xf32>
    %cst_6 = arith.constant 0.000000e+00 : f32
    %16 = vector.broadcast %cst_6 : f32 to vector<8x128xf32>
    %17 = tpu.iota {dimensions = array<i32: 1>} : vector<8x128xi32>
    %18 = vector.extract_strided_slice %14 {offsets = [8, 0], sizes = [8, 128], strides = [1, 1]} : vector<16x128xf32> to vector<8x128xf32>
    %c1_i32 = arith.constant 1 : i32
    %19 = tpu.dynamic_rotate %18 by %c1_i32 dim 1 : vector<8x128xf32>, i32 -> vector<8x128xf32>
    %20 = arith.addf %15, %19 : vector<8x128xf32>
    %c1_i32_7 = arith.constant 1 : i32
    %21 = vector.broadcast %c1_i32_7 : i32 to vector<8x128xi32>
    %22 = arith.cmpi slt, %17, %21 : vector<8x128xi32>
    %cst_8 = arith.constant 0.000000e+00 : f32
    %23 = vector.broadcast %cst_8 : f32 to vector<8x128xf32>
    %24 = arith.select %22, %19, %23 : vector<8x128xi1>, vector<8x128xf32>
    %25 = arith.addf %16, %24 : vector<8x128xf32>
    %26 = arith.subf %20, %25 : vector<8x128xf32>
    %c0_9 = arith.constant 0 : index
    %c0_10 = arith.constant 0 : index
    %27 = vector.load %arg5[%c0_9, %c0_10] : memref<8x128xf32, #tpu.memory_space<vmem>>, vector<8x128xf32>
    %28 = arith.addf %26, %27 : vector<8x128xf32>
    %c0_11 = arith.constant 0 : index
    %c0_12 = arith.constant 0 : index
    %c0_13 = arith.constant 0 : index
    %29 = vector.load %arg4[%c0_11, %c0_12, %c0_13] : memref<1x8x128xf32, #tpu.memory_space<vmem>>, vector<1x8x128xf32>
    %30 = vector.shape_cast %29 : vector<1x8x128xf32> to vector<8x128xf32>
    %31 = vector.shape_cast %28 : vector<8x128xf32> to vector<1x8x128xf32>
    tpu.vector_store %arg4[%c0_11, %c0_12, %c0_13], %31 {strides = array<i32>} : memref<1x8x128xf32, #tpu.memory_space<vmem>>, vector<1x8x128xf32>,
    %c0_14 = arith.constant 0 : index
    %c0_15 = arith.constant 0 : index
    %32 = vector.load %arg5[%c0_14, %c0_15] : memref<8x128xf32, #tpu.memory_space<vmem>>, vector<8x128xf32>
    tpu.vector_store %arg5[%c0_14, %c0_15], %25 {strides = array<i32>} : memref<8x128xf32, #tpu.memory_space<vmem>>, vector<8x128xf32>,
    return
  }
  func.func @transform_0(%arg0: i32, %arg1: i32) -> (i32, i32) {
    %c0_i32 = arith.constant 0 : i32
    %c0_i32_0 = arith.constant 0 : i32
    %c0_i32_1 = arith.constant 0 : i32
    return %c0_i32, %c0_i32_0 : i32, i32
  }
  func.func @transform_1(%arg0: i32, %arg1: i32) -> (i32, i32, i32) {
    %c0_i32 = arith.constant 0 : i32
    %0 = arith.minsi %arg1, %c0_i32 : i32
    %c0_i32_0 = arith.constant 0 : i32
    %c0_i32_1 = arith.constant 0 : i32
    return %arg0, %c0_i32_0, %0 : i32, i32, i32
  }
  func.func @transform_2(%arg0: i32, %arg1: i32) -> (i32, i32, i32) {
    %c0_i32 = arith.constant 0 : i32
    %c0_i32_0 = arith.constant 0 : i32
    return %arg0, %c0_i32, %arg1 : i32, i32, i32
  }
}

</mosaic_0001>

<bundles_post_ra>
// kernel: tpu_custom_call.1
= control target key start
LH: loop header
LB: loop body
LE: loop exit
PB: predicated region body
PF: predicated region fallthrough
CT: control target
= control target key end

     0   :  { %7 = vsyncpa [#allocation4], 0  ;;  %s933_s0 = inlined_call_operand.hbm [shape: f32[16,32], index: 0, kind: input, shape index: {}]   ;;  %s934_s1 = inlined_call_operand.hbm [shape: f32[2,32,128], index: 1, kind: input, shape index: {}]   ;;  %s935_s2 = inlined_call_operand.hbm [shape: f32[2,8,128], index: 2, kind: output, shape index: {}]  }
   0x1   :  { %8 = vsyncpa [#allocation7], 0 }
   0x2   :  { %10 = vsyncpa [#allocation7 + $0x1], 0 }
   0x3   :  { %11 = vsyncpa [#allocation5], 0 }
   0x4   :  { %13 = vsyncpa [#allocation5 + $0x1], 0  ;;  %s709_s9 = smov 0   ;;  %s711_s10 = smov 0  }
   0x5   :  { %s713_s11 = smov 0   ;;  %s715_s12 = smov 0  }
   0x6   :  { %s717_s13 = smov 0   ;;  %s719_s14 = smov 0  }
   0x7 LB: > { %s422_s15 = sadd.s32 4294967295, %s686_s14   ;;  %s423_s16 = sadd.s32 4294967294, %s686_s14   ;;  %s686_s14 = sphi %s719_s14, %s19_s14   ;;  %s682_s13 = sphi %s717_s13, %s959_s13   ;;  %s678_s12 = sphi %s715_s12, %s958_s12   ;;  %s674_s11 = sphi %s713_s11, %s957_s11   ;;  %s670_s10 = sphi %s711_s10, %s956_s10   ;;  %s666_s9 = sphi %s709_s9, %s955_s9  }
   0x8   : > { %p78_p0 = scmp.ne.s32.totalorder %s670_s10, %s666_s9  ;;  %p743_p1 = scmp.eq.s32.totalorder %s422_s15, 0 }
   0x9   : > { %p747_p2 = scmp.eq.s32.totalorder %s422_s15, 1  ;;  %p110_p3 = scmp.eq.s32.totalorder %s423_s16, 1 }
   0xa   : > { %s940_s17 = scalar_select %p743_p1, 1, 0 }
   0xb   : > { %s941_s18 = scalar_select %p747_p2, 1, 0 }
   0xc   : > { %p753_p4 = por %p743_p1, %p78_p0  ;;  %p424_p5 = scmp.ge.s32.totalorder %s686_s14, 1 }
   0xd   : > { %p758_p6 = por %p110_p3, %p78_p0  ;;  %p117_p7 = scmp.lt.s32.totalorder %s686_s14, 3 }
   0xe   : > { %s942_s19 = scalar_select %p753_p4, 1, 0 }
   0xf   : > { %s943_s20 = scalar_select %p758_p6, 1, 0 }
  0x10   : > { %p763_p8 = pnand %p424_p5, %p117_p7  ;;  %s688_s22 = smov [#allocation3]  }
  0x11   : > { %s129_s23 = sshll.u32 %s688_s22, 4  ;;  %s31_s25 = sadd.s32 1, %s682_s13  ;;  %s130_s23 = int_to_ptr.vmem [resolvable:$true] %s129_s23 }
  0x12   : > { %s944_s21 = scalar_select %p763_p8, 1, 0 }
  0x13   : > { %p474_p9 = pneg %p763_p8  ;;  %s542_s28 = scalar_lea.hbm %s933_s0, 256 }
  0x14   : > { %p543_p12 = scmp.ne.s32.totalorder %s933_s0, %s542_s28  ;;  %p549_p5 = scmp.lt.u32.totalorder %s542_s28, %s933_s0 }
  0x15   : > { %p772_p11 = pnand %p474_p9, %p743_p1 }
  0x17   : > { %p544_p13 = pneg %p772_p11 }
  0x19   : > { %p545_p0 = pnand %p544_p13, %p543_p12 }
  0x1b   : > { %p546_p3 = pneg %p545_p0 }
  0x1d   : > { %p551_p7 = pnand %p549_p5, %p546_p3 }
  0x1f   : > { %554 = shalt.err (!%p551_p7)
}
  0x20   : > { %s555_s5 = scalar_lea.vmem %s130_s23, 256  ;;  %p563_p4 = scmp.lt.s32.totalorder %s130_s23, %s130_s23 }
  0x21   : > { %p556_p9 = scmp.ne.s32.totalorder %s130_s23, %s555_s5  ;;  %p564_p1 = scmp.lt.s32.totalorder %s555_s5, %s555_s5 }
  0x23   : > { %p558_p10 = pnand %p556_p9, %p544_p13  ;;  %p565_p8 = por %p564_p1, %p563_p4 }
  0x25   : > { %p559_p6 = pneg %p558_p10 }
  0x27   : > { %p566_p2 = pnand %p565_p8, %p559_p6 }
  0x29   : > { %569 = shalt.err (!%p566_p2)
}
  0x2a   : > { %s689_s6 = smov 128   ;;  %s690_s7 = smov 8  }
  0x2b   : > { %477 = dma.hbm_to_vmem [thread:$0]  (!%p772_p11), %s933_s0, 256, %s130_s23, [#allocation4], %s689_s6, %s689_s6, %s690_s7  }
  0x2c   : > { %p33_p1 = scmp.ge.s32.totalorder %s31_s25, 2  ;;  %s65_s16 = sadd.s32 1, %s674_s11 }
  0x2d   : > { %p72_p2 = scmp.ne.s32.totalorder %s674_s11, %s670_s10  ;;  %p73_p4 = scmp.eq.s32.totalorder %s686_s14, 0 }
  0x2e   : > { %s961_s25 = smov (%p33_p1, %s31_s25), 0  ;;  %p947_p8 = scmp.ne.s32.totalorder %s941_s18, 0 }
  0x2f   : > { %p802_p6 = por %p73_p4, %p72_p2  ;;  %s60_s26 = ssub.s32 %s682_s13, %s961_s25 }
  0x30   : > { %p808_p10 = por %p947_p8, %p72_p2  ;;  %p487_p12 = scmp.lt.s32.totalorder %s686_s14, 2 }
  0x31   : > { %p63_p11 = scmp.eq.s32.totalorder %s60_s26, 0  ;;  %s143_s23 = sand.u32 1, %s674_s11  }
  0x32   : > { %s427_s27 = sshll.u32 %s143_s23, 5  ;;  %s440_s29 = sshll.u32 %s682_s13, 9 }
  0x33   : > { %s817_s28 = scalar_select %p63_p11, %s674_s11, %s65_s16  }
  0x34   : > { %s823_s4 = scalar_lea.hbm %s934_s1, %s440_s29  ;;  %s147_s18 = scalar_lea.vmem [#allocation6], %s427_s27 }
  0x35   : > { %s157_s5 = sshll.u32 %s147_s18, 4  ;;  %p829_p13 = pnand %p487_p12, %p802_p6  ;;  %s825_s5 = int_to_ptr.vmem [resolvable:$true] %s157_s5 }
  0x36   : > { %s833_s15 = scalar_lea.sflag [#allocation7], %s143_s23  ;;  %s570_s16 = scalar_lea.hbm %s823_s4, 512 }
  0x37   : > { %p571_p0 = scmp.ne.s32.totalorder %s823_s4, %s570_s16  ;;  %p572_p3 = pneg %p829_p13 }
  0x38   : > { %s575_s22 = scalar_lea.hbm %s934_s1, 1024  ;;  %p576_p9 = scmp.lt.u32.totalorder %s823_s4, %s934_s1 }
  0x39   : > { %p573_p5 = pnand %p572_p3, %p571_p0  ;;  %p577_p1 = scmp.lt.u32.totalorder %s575_s22, %s570_s16 }
  0x3a   : > { %p579_p4 = scmp.lt.u32.totalorder %s570_s16, %s823_s4 }
  0x3b   : > { %p574_p7 = pneg %p573_p5  ;;  %p578_p2 = por %p577_p1, %p576_p9 }
  0x3d   : > { %p580_p6 = por %p579_p4, %p578_p2 }
  0x3f   : > { %p581_p8 = pnand %p580_p6, %p574_p7 }
  0x41   : > { %584 = shalt.err (!%p581_p8)
}
  0x42   : > { %s585_s23 = scalar_lea.vmem %s825_s5, 512  ;;  %s691_s3 = smov [#allocation6]  }
  0x43   : > { %p586_p12 = scmp.ne.s32.totalorder %s825_s5, %s585_s23  ;;  %s590_s18 = sshll.u32 %s691_s3, 4  ;;  %s591_s18 = int_to_ptr.vmem [resolvable:$false] %s590_s18 }
  0x44   : > { %s592_s26 = scalar_lea.vmem %s591_s18, 1024  ;;  %p593_p5 = scmp.lt.s32.totalorder %s825_s5, %s591_s18 }
  0x45   : > { %p588_p11 = pnand %p586_p12, %p572_p3  ;;  %p594_p9 = scmp.lt.s32.totalorder %s592_s26, %s585_s23 }
  0x47   : > { %p589_p0 = pneg %p588_p11  ;;  %p595_p1 = por %p594_p9, %p593_p5 }
  0x49   : > { %p596_p2 = pnand %p595_p1, %p589_p0 }
  0x4b   : > { %599 = shalt.err (!%p596_p2)
}
  0x4c   : > { %481 = dma.hbm_to_vmem [thread:$0]  (!%p829_p13), %s823_s4, 512, %s825_s5, %s833_s15, %s689_s6, %s689_s6, %s690_s7  }
  0x4d   : > { %p950_p3 = scmp.ne.s32.totalorder %s944_s21, 0 }
  0x4e   : > { %p951_p7 = scmp.ne.s32.totalorder (!%p950_p3), %s940_s17, 0 }
  0x4f   : > { %169 = sbr.rel (%p950_p3) target bundleno = 448 (0x1c0), region = 28 }
  0x56   : > { %653 = dma.done.wait (%p951_p7), [#allocation4], 256  }
  0x57   : > { %655 = vsyncadd (%p951_p7), [#allocation4], 4294967040  ;;  %s871_s16 = sand.u32 1, %s670_s10   ;;  %p952_p4 = scmp.ne.s32.totalorder %s942_s19, 0 }
  0x58   : > { %s432_s8 = sshll.u32 %s871_s16, 5  ;;  %s176_s27 = scalar_lea.sflag [#allocation7], %s871_s16 }
  0x59   : > { %s179_s22 = scalar_lea.vmem [#allocation6], %s432_s8 }
  0x5a   : > { %657 = dma.done.wait (%p952_p4), %s176_s27, 512  }
  0x5b   : > { %659 = vsyncadd (%p952_p4), %s176_s27, 4294966784  ;;  %vm213_vm0 = vcmask 261120   ;;  %v209_v0 = vld [vmem:[%s179_s22] sm:$0xff]  ;;  %v210_v1 = vld [vmem:[%s179_s22 + $0x8] sm:$0xff]  ;;  %v296_v8 = vlaneseq  ;;  %s692_s17 = smov 1   ;;  %s433_s19 = sshll.u32 %s871_s16, 3 }
  0x5c   : > { %v211_v2 = vld [vmem:[%s179_s22 + $0x10] sm:$0xff]  ;;  %v458_v3 = vpack.c.bf16 %v210_v1, %v209_v0  ;;  %v212_v4 = vld [vmem:[%s179_s22 + $0x18] sm:$0xff]  ;;  %s437_s21 = sshll.u32 %s678_s12, 7  ;;  %s199_s6 = scalar_lea.vmem [#allocation8], %s433_s19 }
  0x5d   : > { %v207_v5 = vld [vmem:[#allocation3] sm:$0xff]  ;;  %v462_v6 = vpack.c.bf16 %v212_v4, %v211_v2  ;;  %v208_v7 = vld [vmem:[#allocation3 + $0x8] sm:$0xff]  ;;  %v297_v9 = vand.u32 127, %v296_v8  ;;  %s329_s7 = sshll.u32 %s199_s6, 4  ;;  %s884_s15 = scalar_lea.hbm %s935_s2, %s437_s21  ;;  %s886_s7 = int_to_ptr.vmem [resolvable:$true] %s329_s7 }
  0x5e   : > { %455 = vmatprep.mubr.msk.f32.mxu0 %vm213_vm0, %v207_v5  ;;  %459 = vmatprep.subr.bf16.mxu0 %v458_v3  ;;  %s315_s29 = scalar_lea.sflag [#allocation5], %s871_s16  ;;  %s600_s30 = scalar_lea.vmem %s886_s7, 128 }
  0x5f   : > { %461 = vmatpush3.bf16.msra.mxu0 %v458_v3  ;;  %vm300_vm1 = vcmp.lt.s32.totalorder %v297_v9, 16  ;;  %vm306_vm2 = vcmp.lt.s32.totalorder %v297_v9, 1  ;;  %p601_p13 = scmp.ne.s32.totalorder %s886_s7, %s600_s30  ;;  %s693_s12 = smov [#allocation8]  }
  0x60   : > { %463 = vmatprep.subr.bf16.mxu0 %v462_v6  ;;  %s604_s23 = sshll.u32 %s693_s12, 4  ;;  %s605_s23 = int_to_ptr.vmem [resolvable:$false] %s604_s23 }
  0x61   : > { %p602_p6 = pnand %p601_p13, %p808_p10  ;;  %s606_s3 = scalar_lea.vmem %s605_s23, 256 }
  0x62   : > { %p607_p12 = scmp.lt.s32.totalorder %s886_s7, %s605_s23  ;;  %p608_p11 = scmp.lt.s32.totalorder %s606_s3, %s600_s30 }
  0x63   : > { %465 = vmatpush3.bf16.msra.mxu0 %v462_v6  ;;  %p603_p8 = pneg %p602_p6 }
  0x64   : > { %p609_p0 = por %p608_p11, %p607_p12 }
  0x66   : > { %456 = vmatmul.mubr.msk.f32.vlgmr.msra.gmra.mrb[0].mxu0 %vm213_vm0, %v208_v7  ;;  %p610_p5 = pnand %p609_p0, %p603_p8 }
 0x139   : > { %v457_v10 = vpop.f32.mrb[0].mxu0 }
 0x13a   : > { %v286_v11 = vpop.f32.mrb[1].mxu0  ;;  %v302_v12 = vsel %vm300_vm1, %v457_v10, 0.0 }
 0x13b   : > { %v301_v13 = vsel %vm300_vm1, %v286_v11, 0.0  ;;  %303 = vrot.lane.b32.xlu0 %v302_v12, %s692_s17 }
 0x1ad   : > { %v304_v14 = vpop.permute.xlu0 %303 }
 0x1ae   : > { %v305_v15 = vadd.f32 %v304_v14, %v301_v13  ;;  %v307_v16 = vsel %vm306_vm2, %v304_v14, 0.0 }
 0x1b0   : > { %v309_v17 = vsub.f32 %v305_v15, %v307_v16 }
 0x1b2   : > { %312 = vst [vmem:[%s199_s6] sm:$0xff] %v309_v17 }
 0x1b3   : > { %613 = shalt.err (!%p610_p5)
}
 0x1b4   : > { %s614_s18 = scalar_lea.hbm %s884_s15, 128  ;;  %s618_s8 = scalar_lea.hbm %s935_s2, 256 }
 0x1b5   : > { %p615_p9 = scmp.ne.s32.totalorder %s884_s15, %s614_s18  ;;  %p619_p3 = scmp.lt.u32.totalorder %s884_s15, %s935_s2 }
 0x1b6   : > { %p620_p7 = scmp.lt.u32.totalorder %s618_s8, %s614_s18  ;;  %p622_p13 = scmp.lt.u32.totalorder %s614_s18, %s884_s15 }
 0x1b7   : > { %p616_p1 = pnand %p615_p9, %p808_p10 }
 0x1b8   : > { %p621_p4 = por %p620_p7, %p619_p3 }
 0x1b9   : > { %p617_p2 = pneg %p616_p1 }
 0x1ba   : > { %p623_p6 = por %p622_p13, %p621_p4 }
 0x1bc   : > { %p624_p8 = pnand %p623_p6, %p617_p2 }
 0x1be   : > { %627 = shalt.err (!%p624_p8)
}
 0x1bf   : > { %472 = dma.vmem_to_hbm [thread:$0]  (%p808_p10), %s886_s7, 128, %s884_s15, %s315_s29  }
 0x1c0 PF: > { %s341_s17 = sand.u32 1, %s666_s9   ;;  %p953_p12 = scmp.ne.s32.totalorder %s943_s20, 0 }
 0x1c1   : > { %p954_p11 = scmp.ge.s32.totalorder %s686_s14, 2  ;;  %s342_s19 = scalar_lea.sflag [#allocation5], %s341_s17 }
 0x1c3   : > { %p483_p0 = pnand %p954_p11, %p953_p12 }
 0x1c5   : > { %661 = dma.done.wait (!%p483_p0), %s342_s19, 128  }
 0x1c6   : > { %663 = vsyncadd (!%p483_p0), %s342_s19, 4294967168  ;;  %s19_s14 = sadd.s32 1, %s686_s14   ;;  %s955_s9 = smov %s670_s10 }
 0x1c7   : > { %p16_p5 = scmp.ge.s32.totalorder %s19_s14, 4   ;;  %s956_s10 = smov %s674_s11 }
 0x1c8   : > { %s957_s11 = smov %s817_s28  ;;  %s958_s12 = smov %s682_s13 }
 0x1c9   : > { %s959_s13 = smov %s961_s25  ;;  %18 = sbr.rel (!%p16_p5) target bundleno = 7 (0x7), region = 82 }
 0x1d0   :  { %347 = vsyncpa [#allocation4], 1 }
 0x1d1   :  { %349 = vsyncpa [#allocation4 + $0x1], 1 }
 0x1d2   :  { %350 = vsyncpa [#allocation7], 1 }
 0x1d3   :  { %352 = vsyncpa [#allocation7 + $0x1], 1 }
 0x1d4   :  { %353 = vsyncpa [#allocation5], 1 }
 0x1d5   :  { %355 = vsyncpa [#allocation5 + $0x1], 1 }

</bundles_post_ra>
